<compile_context>
chip_gen: v5e
topology: v5e:2x2
jax: 0.10.0
libtpu: 0.0.40
codegen_flags: <defaults>
</compile_context>

<pallas_src>
import functools

import jax
import jax.numpy as jnp
from jax.experimental import pallas as pl
from jax.experimental.pallas import tpu as pltpu

EPS = 1e-5  # nn.LayerNorm default


def _round_up(v, m):
    return ((v + m - 1) // m) * m


def prenorm_linear_kernel(x_ref, m_ref, g_ref, b_ref, w_ref, wb_ref, o_ref,
                          *, c_orig, channel_padded):
    """One (tm, Cp) tile of flattened tokens.

    x_ref : (tm, Cp)  input rows (channels zero-padded to Cp)
    m_ref : (1, Cp)   f32 channel-valid mask (1 for real channels, 0 for pad)
    g_ref : (1, Cp)   f32 LayerNorm gamma (zero-padded)
    b_ref : (1, Cp)   f32 LayerNorm beta  (zero-padded)
    w_ref : (Cp, Cp)  Linear weight, transposed to (Cin, Cout), zero-padded
    wb_ref: (1, Cp)   f32 Linear bias (zero-padded)
    o_ref : (tm, Cp)  output rows
    """
    x = x_ref[...].astype(jnp.float32)          # LN stats in f32 (needed on v5e)
    inv_c = 1.0 / c_orig

    # Mean over the *original* C channels; padded channels are zero so a plain
    # sum divided by C is exact.
    mean = jnp.sum(x, axis=-1, keepdims=True) * inv_c
    diff = x - mean
    if channel_padded:
        # Zero the padded channels before the variance reduction (one VPU mul).
        diff = diff * m_ref[...]

    var = jnp.sum(diff * diff, axis=-1, keepdims=True) * inv_c
    xn = diff * jax.lax.rsqrt(var + EPS)        # rsqrt -> EUP slot (cheap)

    # Affine. gamma/beta are zero in padded channels -> padded y stays 0.
    y = xn * g_ref[...] + b_ref[...]

    # fn = Linear(C, C): MXU operands in the weight's native dtype (bf16 at
    # full MXU rate when params are bf16); accumulate in f32.
    y = y.astype(w_ref.dtype)
    out = jnp.dot(y, w_ref[...], preferred_element_type=jnp.float32)
    out = out + wb_ref[...]
    o_ref[...] = out.astype(o_ref.dtype)


def _pick_tm(M, Cp, in_dsize, w_dsize, row_align, vmem_budget):
    """Largest power-of-two row tile whose per-step VMEM footprint fits the budget."""
    # Resident params are still double-buffered by the default pipeliner; x and
    # out blocks are double-buffered; plus ~4 f32 temporaries of the tile.
    param_bytes = 2 * Cp * Cp * w_dsize + 2 * 4 * Cp * 4
    tm = 1024
    while tm > row_align:
        need = param_bytes + 4 * tm * Cp * in_dsize + 4 * tm * Cp * 4
        if need <= vmem_budget:
            break
        tm //= 2
    tm = max(row_align, min(tm, _round_up(M, row_align)))
    # Shrink the tile if row-padding would waste >25% of the work (keep the
    # halved value aligned to the sublane requirement).
    while ((tm // 2) >= max(row_align, 128)
           and (tm // 2) % row_align == 0
           and (_round_up(M, tm) - M) * 4 > _round_up(M, tm)):
        tm //= 2
    return tm


def prenorm_linear(x, gamma, beta, weight, bias, *, tm=None,
                   vmem_budget=12 * 1024 * 1024):
    """PreNorm(LayerNorm(C), Linear(C->C)).

    x: (B, N, C); gamma/beta: (C,); weight: (C_out, C_in) torch layout; bias: (C_out,).
    """
    B, N, C = x.shape
    M = B * N
    dtype = x.dtype
    in_dsize = jnp.dtype(dtype).itemsize
    w_dsize = jnp.dtype(weight.dtype).itemsize

    # Lane-dense channel dim: pad to a multiple of 128 lanes.
    Cp = _round_up(max(C, 128), 128)
    channel_padded = (Cp != C)
    # Sublane alignment for the row tile: 8 for f32, 16 for bf16.
    row_align = 16 if dtype == jnp.bfloat16 else 8

    if tm is None:
        tm = _pick_tm(M, Cp, in_dsize, w_dsize, row_align, vmem_budget)
    Mp = _round_up(M, tm)
    grid = (pl.cdiv(Mp, tm),)

    # Wrapper-side padding (zeros), only when actually needed. Padded
    # gamma/beta/bias/weight are zero so padded output channels are exactly
    # zero and get sliced off below. Small vectors are pre-cast to f32 so the
    # kernel does no per-step widening of them.
    x2 = x.reshape(M, C)
    if Mp != M or channel_padded:
        x2 = jnp.pad(x2, ((0, Mp - M), (0, Cp - C)))

    g2 = gamma.astype(jnp.float32)
    b2 = beta.astype(jnp.float32)
    wb2 = bias.astype(jnp.float32)
    wt = weight.T                                            # (Cin, Cout)
    if channel_padded:
        g2 = jnp.pad(g2, (0, Cp - C))
        b2 = jnp.pad(b2, (0, Cp - C))
        wb2 = jnp.pad(wb2, (0, Cp - C))
        wt = jnp.pad(wt, ((0, Cp - C), (0, Cp - C)))
    g2 = g2.reshape(1, Cp)
    b2 = b2.reshape(1, Cp)
    wb2 = wb2.reshape(1, Cp)
    mask = (jnp.arange(Cp) < C).astype(jnp.float32).reshape(1, Cp)

    cost = pl.CostEstimate(
        flops=2 * Mp * Cp * Cp,
        transcendentals=Mp,                                   # one rsqrt per row
        bytes_accessed=2 * Mp * Cp * in_dsize + Cp * Cp * w_dsize + 4 * Cp * 4,
    )

    out = pl.pallas_call(
        functools.partial(prenorm_linear_kernel, c_orig=C,
                          channel_padded=channel_padded),
        out_shape=jax.ShapeDtypeStruct((Mp, Cp), dtype),
        grid_spec=pltpu.PrefetchScalarGridSpec(
            num_scalar_prefetch=0,
            grid=grid,
            in_specs=[
                pl.BlockSpec((tm, Cp), lambda i: (i, 0)),   # x rows (pipelined)
                pl.BlockSpec((1, Cp), lambda i: (0, 0)),    # channel mask (resident)
                pl.BlockSpec((1, Cp), lambda i: (0, 0)),    # gamma (resident)
                pl.BlockSpec((1, Cp), lambda i: (0, 0)),    # beta  (resident)
                pl.BlockSpec((Cp, Cp), lambda i: (0, 0)),   # weight^T (resident)
                pl.BlockSpec((1, Cp), lambda i: (0, 0)),    # bias  (resident)
            ],
            out_specs=pl.BlockSpec((tm, Cp), lambda i: (i, 0)),
        ),
        compiler_params=pltpu.CompilerParams(
            dimension_semantics=("parallel",)),              # megacore-shardable
        cost_estimate=cost,
    )(x2, mask, g2, b2, wt, wb2)

    if Mp != M or channel_padded:
        out = out[:M, :C]
    return out.reshape(B, N, C)


def prenorm_linear_ref(x, gamma, beta, weight, bias):
    xf = x.astype(jnp.float32)
    mean = jnp.mean(xf, axis=-1, keepdims=True)
    var = jnp.mean((xf - mean) ** 2, axis=-1, keepdims=True)
    xn = (xf - mean) * jax.lax.rsqrt(var + EPS)
    y = (xn * gamma + beta).astype(weight.dtype)
    out = jnp.dot(y, weight.T, preferred_element_type=jnp.float32)
    out = out + bias.astype(jnp.float32)
    return out.astype(x.dtype)


if __name__ == "__main__":
    key = jax.random.PRNGKey(0)
    B, N, C = 2, 8, 32  # batch=2, seq=8, in_channels=32
    kx, kg, kb, kw, kwb = jax.random.split(key, 5)

    x = jax.random.normal(kx, (B, N, C), dtype=jnp.float32)
    # LayerNorm params (deterministic, slightly perturbed from default init)
    gamma = 1.0 + 0.1 * jax.random.normal(kg, (C,), dtype=jnp.float32)
    beta = 0.1 * jax.random.normal(kb, (C,), dtype=jnp.float32)
    # fn = Linear(C, C) params (torch layout: weight (out, in))
    weight = 0.1 * jax.random.normal(kw, (C, C), dtype=jnp.float32)
    bias = 0.1 * jax.random.normal(kwb, (C,), dtype=jnp.float32)

    # f32 path
    out = prenorm_linear(x, gamma, beta, weight, bias)
    jax.block_until_ready(out)
    ref = prenorm_linear_ref(x, gamma, beta, weight, bias)
    assert out.shape == (B, N, C)
    assert jnp.allclose(out, ref, atol=1e-4, rtol=1e-4), "f32 mismatch vs reference"

    # bf16 path (native full-rate MXU operands; LN stats remain f32)
    xb = x.astype(jnp.bfloat16)
    gb = gamma.astype(jnp.bfloat16)
    bb = beta.astype(jnp.bfloat16)
    wb = weight.astype(jnp.bfloat16)
    bbias = bias.astype(jnp.bfloat16)
    out_b = prenorm_linear(xb, gb, bb, wb, bbias)
    jax.block_until_ready(out_b)
    ref_b = prenorm_linear_ref(xb, gb, bb, wb, bbias)
    assert out_b.shape == (B, N, C)
    assert jnp.allclose(out_b.astype(jnp.float32), ref_b.astype(jnp.float32),
                        atol=2e-2, rtol=2e-2), "bf16 mismatch vs reference"

    # TODO(synk): PreNorm's `fn` is generic in PyTorch; here it is concretely
    # fused as Linear(C->C). Other `fn` choices would need their own fusion.
    print("KERNEL_OK")
</pallas_src>

<mosaic_0001>
module attributes {stable_mosaic.version = 11 : i64} {
  func.func @prenorm_linear_kernel(%arg0: i32, %arg1: memref<16x128xf32, #tpu.memory_space<vmem>>, %arg2: memref<1x128xf32, #tpu.memory_space<vmem>>, %arg3: memref<1x128xf32, #tpu.memory_space<vmem>>, %arg4: memref<1x128xf32, #tpu.memory_space<vmem>>, %arg5: memref<128x128xf32, #tpu.memory_space<vmem>>, %arg6: memref<1x128xf32, #tpu.memory_space<vmem>>, %arg7: memref<16x128xf32, #tpu.memory_space<vmem>>) attributes {dimension_semantics = [#tpu.dimension_semantics<parallel>], iteration_bounds = array<i64: 1>, scalar_prefetch = 0 : i64, scratch_operands = 0 : i64, tpu.core_type = #tpu.core_type<tc>, window_params = [{transform_indices = @transform_0, window_bounds = array<i64: 16, 128>}, {pipeline_mode = #tpu.pipeline_mode<synchronous>, transform_indices = @transform_1, window_bounds = array<i64: 1, 128>}, {pipeline_mode = #tpu.pipeline_mode<synchronous>, transform_indices = @transform_2, window_bounds = array<i64: 1, 128>}, {pipeline_mode = #tpu.pipeline_mode<synchronous>, transform_indices = @transform_3, window_bounds = array<i64: 1, 128>}, {pipeline_mode = #tpu.pipeline_mode<synchronous>, transform_indices = @transform_4, window_bounds = array<i64: 128, 128>}, {pipeline_mode = #tpu.pipeline_mode<synchronous>, transform_indices = @transform_5, window_bounds = array<i64: 1, 128>}, {transform_indices = @transform_6, window_bounds = array<i64: 16, 128>}]} {
    %c0 = arith.constant 0 : index
    %c0_0 = arith.constant 0 : index
    %0 = vector.load %arg1[%c0, %c0_0] : memref<16x128xf32, #tpu.memory_space<vmem>>, vector<16x128xf32>
    %cst = arith.constant dense<0.000000e+00> : vector<16xf32>
    %1 = vector.multi_reduction <add>, %0, %cst [1] : vector<16x128xf32> to vector<16xf32>
    %2 = vector.shape_cast %1 : vector<16xf32> to vector<16x1xf32>
    %cst_1 = arith.constant 3.125000e-02 : f32
    %3 = vector.broadcast %cst_1 : f32 to vector<16x1xf32>
    %4 = arith.mulf %2, %3 : vector<16x1xf32>
    %5 = vector.broadcast %4 : vector<16x1xf32> to vector<16x128xf32>
    %6 = arith.subf %0, %5 : vector<16x128xf32>
    %c0_2 = arith.constant 0 : index
    %c0_3 = arith.constant 0 : index
    %7 = vector.load %arg2[%c0_2, %c0_3] : memref<1x128xf32, #tpu.memory_space<vmem>>, vector<1x128xf32>
    %8 = vector.broadcast %7 : vector<1x128xf32> to vector<16x128xf32>
    %9 = arith.mulf %6, %8 : vector<16x128xf32>
    %10 = arith.mulf %9, %9 : vector<16x128xf32>
    %cst_4 = arith.constant dense<0.000000e+00> : vector<16xf32>
    %11 = vector.multi_reduction <add>, %10, %cst_4 [1] : vector<16x128xf32> to vector<16xf32>
    %12 = vector.shape_cast %11 : vector<16xf32> to vector<16x1xf32>
    %cst_5 = arith.constant 3.125000e-02 : f32
    %13 = vector.broadcast %cst_5 : f32 to vector<16x1xf32>
    %14 = arith.mulf %12, %13 : vector<16x1xf32>
    %cst_6 = arith.constant 9.99999974E-6 : f32
    %15 = vector.broadcast %cst_6 : f32 to vector<16x1xf32>
    %16 = arith.addf %14, %15 : vector<16x1xf32>
    %17 = math.rsqrt %16 : vector<16x1xf32>
    %18 = vector.broadcast %17 : vector<16x1xf32> to vector<16x128xf32>
    %19 = arith.mulf %9, %18 : vector<16x128xf32>
    %c0_7 = arith.constant 0 : index
    %c0_8 = arith.constant 0 : index
    %20 = vector.load %arg3[%c0_7, %c0_8] : memref<1x128xf32, #tpu.memory_space<vmem>>, vector<1x128xf32>
    %21 = vector.broadcast %20 : vector<1x128xf32> to vector<16x128xf32>
    %22 = arith.mulf %19, %21 : vector<16x128xf32>
    %c0_9 = arith.constant 0 : index
    %c0_10 = arith.constant 0 : index
    %23 = vector.load %arg4[%c0_9, %c0_10] : memref<1x128xf32, #tpu.memory_space<vmem>>, vector<1x128xf32>
    %24 = vector.broadcast %23 : vector<1x128xf32> to vector<16x128xf32>
    %25 = arith.addf %22, %24 : vector<16x128xf32>
    %c0_11 = arith.constant 0 : index
    %c0_12 = arith.constant 0 : index
    %26 = vector.load %arg5[%c0_11, %c0_12] : memref<128x128xf32, #tpu.memory_space<vmem>>, vector<128x128xf32>
    %cst_13 = arith.constant dense<0.000000e+00> : vector<16x128xf32>
    %27 = tpu.matmul %25, %26, %cst_13 {dimension_numbers = #tpu.dot_dimension_numbers<[1], [0], [0], [1], [0, 0, 1, 1], [], []>} : vector<16x128xf32>, vector<128x128xf32>, vector<16x128xf32> -> vector<16x128xf32>
    %c0_14 = arith.constant 0 : index
    %c0_15 = arith.constant 0 : index
    %28 = vector.load %arg6[%c0_14, %c0_15] : memref<1x128xf32, #tpu.memory_space<vmem>>, vector<1x128xf32>
    %29 = vector.broadcast %28 : vector<1x128xf32> to vector<16x128xf32>
    %30 = arith.addf %27, %29 : vector<16x128xf32>
    %c0_16 = arith.constant 0 : index
    %c0_17 = arith.constant 0 : index
    %31 = vector.load %arg7[%c0_16, %c0_17] : memref<16x128xf32, #tpu.memory_space<vmem>>, vector<16x128xf32>
    tpu.vector_store %arg7[%c0_16, %c0_17], %30 {strides = array<i32>} : memref<16x128xf32, #tpu.memory_space<vmem>>, vector<16x128xf32>,
    return
  }
  func.func @transform_0(%arg0: i32) -> (i32, i32) {
    %c0_i32 = arith.constant 0 : i32
    %c0_i32_0 = arith.constant 0 : i32
    return %arg0, %c0_i32 : i32, i32
  }
  func.func @transform_1(%arg0: i32) -> (i32, i32) {
    %c0_i32 = arith.constant 0 : i32
    %c0_i32_0 = arith.constant 0 : i32
    %c0_i32_1 = arith.constant 0 : i32
    return %c0_i32, %c0_i32_0 : i32, i32
  }
  func.func @transform_2(%arg0: i32) -> (i32, i32) {
    %c0_i32 = arith.constant 0 : i32
    %c0_i32_0 = arith.constant 0 : i32
    %c0_i32_1 = arith.constant 0 : i32
    return %c0_i32, %c0_i32_0 : i32, i32
  }
  func.func @transform_3(%arg0: i32) -> (i32, i32) {
    %c0_i32 = arith.constant 0 : i32
    %c0_i32_0 = arith.constant 0 : i32
    %c0_i32_1 = arith.constant 0 : i32
    return %c0_i32, %c0_i32_0 : i32, i32
  }
  func.func @transform_4(%arg0: i32) -> (i32, i32) {
    %c0_i32 = arith.constant 0 : i32
    %c0_i32_0 = arith.constant 0 : i32
    %c0_i32_1 = arith.constant 0 : i32
    return %c0_i32, %c0_i32_0 : i32, i32
  }
  func.func @transform_5(%arg0: i32) -> (i32, i32) {
    %c0_i32 = arith.constant 0 : i32
    %c0_i32_0 = arith.constant 0 : i32
    %c0_i32_1 = arith.constant 0 : i32
    return %c0_i32, %c0_i32_0 : i32, i32
  }
  func.func @transform_6(%arg0: i32) -> (i32, i32) {
    %c0_i32 = arith.constant 0 : i32
    %c0_i32_0 = arith.constant 0 : i32
    return %arg0, %c0_i32 : i32, i32
  }
}

</mosaic_0001>

<bundles_post_ra>
// kernel: tpu_custom_call.1
= control target key start
LH: loop header
LB: loop body
LE: loop exit
PB: predicated region body
PF: predicated region fallthrough
CT: control target
= control target key end

     0   :  { %11 = vsyncpa [#allocation3], 0  ;;  %s407_s0 = inlined_call_operand.hbm [shape: f32[16,128], index: 0, kind: input, shape index: {}]   ;;  %s408_s1 = inlined_call_operand.hbm [shape: f32[1,128], index: 1, kind: input, shape index: {}]   ;;  %s409_s2 = inlined_call_operand.vmem [shape: f32[1,128], index: 2, kind: input, shape index: {}]   ;;  %s410_s3 = inlined_call_operand.vmem [shape: f32[1,128], index: 3, kind: input, shape index: {}]   ;;  %s411_s4 = inlined_call_operand.hbm [shape: f32[128,128], index: 4, kind: input, shape index: {}]   ;;  %s412_s5 = inlined_call_operand.vmem [shape: f32[1,128], index: 5, kind: input, shape index: {}]   ;;  %s413_s6 = inlined_call_operand.hbm [shape: f32[16,128], index: 6, kind: output, shape index: {}]  }
   0x1   :  { %12 = vsyncpa [#allocation6], 0  ;;  %s32_s23 = sshll.u32 %s408_s1, 4  ;;  %s33_s23 = int_to_ptr.hbm [resolvable:$true] %s32_s23 }
   0x2   :  { %13 = vsyncpa [#allocation4], 0  ;;  %s326_s24 = smov [#allocation5]   ;;  %s18_s28 = sshll.u32 %s407_s0, 4  ;;  %s19_s28 = int_to_ptr.hbm [resolvable:$true] %s18_s28 }
   0x3   :  { %s34_s25 = sshll.u32 %s326_s24, 4  ;;  %s327_s29 = smov [#allocation2]   ;;  %s35_s25 = int_to_ptr.vmem [resolvable:$true] %s34_s25 }
   0x4   :  { %37 = dma.hbm_to_vmem [thread:$0]  %s33_s23, 16, %s35_s25, [#allocation6]  }
   0x5   :  { %s20_s30 = sshll.u32 %s327_s29, 4  ;;  %s328_s7 = smov 128   ;;  %s21_s30 = int_to_ptr.vmem [resolvable:$true] %s20_s30 }
   0x6   :  { %s329_s8 = smov 8   ;;  %s46_s10 = sshll.u32 %s411_s4, 4  ;;  %s47_s10 = int_to_ptr.hbm [resolvable:$true] %s46_s10 }
   0x7   :  { %26 = dma.hbm_to_vmem [thread:$0]  %s19_s28, 256, %s21_s30, [#allocation3], %s328_s7, %s328_s7, %s329_s8  }
   0x8   :  { %s330_s11 = smov [#allocation7]  }
   0x9   :  { %s48_s12 = sshll.u32 %s330_s11, 4  ;;  %s49_s12 = int_to_ptr.vmem [resolvable:$true] %s48_s12 }
   0xa   :  { %54 = dma.hbm_to_vmem [thread:$0]  %s47_s10, 2048, %s49_s12, [#allocation6], %s328_s7, %s328_s7, %s329_s8  }
   0xb   :  { %320 = dma.done.wait [#allocation3], 256  }
   0xc   :  { %321 = vsyncadd [#allocation3], 4294967040 }
   0xd   :  { %322 = dma.done.wait [#allocation6], 2064  }
   0xe   :  { %323 = vsyncadd [#allocation6], 4294965232  ;;  %v69_v0 = vld [vmem:[#allocation2] sm:$0xff]  ;;  %v70_v1 = vld [vmem:[#allocation2 + $0x8] sm:$0xff]  ;;  %s180_s19 = sshll.u32 %s413_s6, 4  ;;  %s181_s19 = int_to_ptr.hbm [resolvable:$true] %s180_s19 }
   0xf   :  { %71 = vadd.xlane.f32.xlu0 %v69_v0  ;;  %v144_v2 = vld [vmem:[#allocation7 + $0x78] sm:$0xff]  ;;  %v143_v3 = vld [vmem:[#allocation7 + $0x70] sm:$0xff]  ;;  %v142_v15 = vld [vmem:[#allocation7 + $0x68] sm:$0xff] }
  0x10   :  { %149 = vmatpush.msra.mxu0 %v144_v2  ;;  %194 = vmatpush.msra.mxu1 %v144_v2  ;;  %v216_v6 = vld [vmem:[#allocation5] ss:$0 sm:$0xff]  ;;  %v141_v16 = vld [vmem:[#allocation7 + $0x60] sm:$0xff]  ;;  %v139_v18 = vld [vmem:[#allocation7 + $0x50] sm:$0xff] }
  0x11   :  { %v140_v17 = vld [vmem:[#allocation7 + $0x58] sm:$0xff]  ;;  %v138_v19 = vld [vmem:[#allocation7 + $0x48] sm:$0xff]  ;;  %v137_v20 = vld [vmem:[#allocation7 + $0x40] sm:$0xff] }
  0x12   :  { %150 = vmatpush.msra.mxu0 %v143_v3  ;;  %195 = vmatpush.msra.mxu1 %v143_v3  ;;  %v136_v21 = vld [vmem:[#allocation7 + $0x38] sm:$0xff]  ;;  %v135_v22 = vld [vmem:[#allocation7 + $0x30] sm:$0xff]  ;;  %v134_v23 = vld [vmem:[#allocation7 + $0x28] sm:$0xff] }
  0x13   :  { %v133_v24 = vld [vmem:[#allocation7 + $0x20] sm:$0xff]  ;;  %v132_v25 = vld [vmem:[#allocation7 + $0x18] sm:$0xff]  ;;  %v131_v26 = vld [vmem:[#allocation7 + $0x10] sm:$0xff] }
  0x14   :  { %151 = vmatpush.msra.mxu0 %v142_v15  ;;  %196 = vmatpush.msra.mxu1 %v142_v15  ;;  %v130_v27 = vld [vmem:[#allocation7 + $0x8] sm:$0xff]  ;;  %v129_v28 = vld [vmem:[#allocation7] sm:$0xff] }
  0x15   :  { %v217_v43 = vld [vmem:[%s409_s2] ss:$0 sm:$0xff] }
  0x16   :  { %152 = vmatpush.msra.mxu0 %v141_v16  ;;  %197 = vmatpush.msra.mxu1 %v141_v16  ;;  %v218_v47 = vld [vmem:[%s410_s3] ss:$0 sm:$0xff]  ;;  %s331_s3 = smov [#allocation8]  }
  0x17   :  { %73 = vadd.xlane.f32.xlu0 %v70_v1  ;;  %v219_v57 = vld [vmem:[%s412_s5] ss:$0 sm:$0xff]  ;;  %s178_s16 = sshll.u32 %s331_s3, 4  ;;  %s179_s16 = int_to_ptr.vmem [resolvable:$true] %s178_s16 }
  0x18   :  { %153 = vmatpush.msra.mxu0 %v140_v17  ;;  %198 = vmatpush.msra.mxu1 %v140_v17 }
  0x1a   :  { %154 = vmatpush.msra.mxu0 %v139_v18  ;;  %199 = vmatpush.msra.mxu1 %v139_v18 }
  0x1c   :  { %155 = vmatpush.msra.mxu0 %v138_v19  ;;  %200 = vmatpush.msra.mxu1 %v138_v19 }
  0x1e   :  { %156 = vmatpush.msra.mxu0 %v137_v20  ;;  %201 = vmatpush.msra.mxu1 %v137_v20 }
  0x20   :  { %157 = vmatpush.msra.mxu0 %v136_v21  ;;  %202 = vmatpush.msra.mxu1 %v136_v21 }
  0x22   :  { %158 = vmatpush.msra.mxu0 %v135_v22  ;;  %203 = vmatpush.msra.mxu1 %v135_v22 }
  0x24   :  { %159 = vmatpush.msra.mxu0 %v134_v23  ;;  %204 = vmatpush.msra.mxu1 %v134_v23 }
  0x26   :  { %160 = vmatpush.msra.mxu0 %v133_v24  ;;  %205 = vmatpush.msra.mxu1 %v133_v24 }
  0x28   :  { %161 = vmatpush.msra.mxu0 %v132_v25  ;;  %206 = vmatpush.msra.mxu1 %v132_v25 }
  0x2a   :  { %162 = vmatpush.msra.mxu0 %v131_v26  ;;  %207 = vmatpush.msra.mxu1 %v131_v26 }
  0x2c   :  { %163 = vmatpush.msra.mxu0 %v130_v27  ;;  %208 = vmatpush.msra.mxu1 %v130_v27 }
  0x2e   :  { %164 = vmatpush.msra.mxu0 %v129_v28  ;;  %209 = vmatpush.msra.mxu1 %v129_v28 }
  0x82   :  { %v72_v4 = vpop.xlane.xlu0 %71 }
  0x83   :  { %v75_v5 = vmul.f32 0.03125, %v72_v4 }
  0x85   :  { %v77_v7 = vsub.f32 %v69_v0, %v75_v5 }
  0x87   :  { %v382_v8 = vmul.f32 %v216_v6, %v77_v7 }
  0x89   :  { %v85_v9 = vmul.f32 %v382_v8, %v382_v8 }
  0x8a   :  { %v74_v10 = vpop.xlane.xlu0 %73 }
  0x8b   :  { %v76_v11 = vmul.f32 0.03125, %v74_v10  ;;  %87 = vadd.xlane.f32.xlu1 %v85_v9 }
  0x8d   :  { %v78_v12 = vsub.f32 %v70_v1, %v76_v11 }
  0x8f   :  { %v386_v13 = vmul.f32 %v216_v6, %v78_v12 }
  0x91   :  { %v86_v14 = vmul.f32 %v386_v13, %v386_v13 }
  0x93   :  { %89 = vadd.xlane.f32.xlu1 %v86_v14 }
  0xfe   :  { %v88_v29 = vpop.xlane.xlu1 %87 }
  0xff   :  { %v91_v30 = vmul.f32 0.03125, %v88_v29 }
 0x101   :  { %v93_v31 = vadd.f32 1e-05, %v91_v30 }
 0x103   :  { %220 = vrsqrt.f32 %v93_v31  ;;  %vm101_vm1 = vweird.f32 %v93_v31 }
 0x106   :  { %v90_v32 = vpop.xlane.xlu1 %89 }
 0x107   :  { %v92_v33 = vmul.f32 0.03125, %v90_v32 }
 0x109   :  { %v221_v34 = vpop.eup %220  ;;  %v94_v35 = vadd.f32 1e-05, %v92_v33 }
 0x10a   :  { %v96_v36 = vmul.f32 %v221_v34, %v93_v31  ;;  %vm102_vm0 = vweird.f32 %v221_v34 }
 0x10b   :  { %222 = vrsqrt.f32 %v94_v35  ;;  %vm103_vm2 = vmor %vm101_vm1, %vm102_vm0  ;;  %vm111_vm4 = vweird.f32 %v94_v35 }
 0x10c   :  { %v97_v37 = vmul.f32 %v221_v34, %v96_v36 }
 0x10e   :  { %v98_v38 = vmul.f32 0.5, %v97_v37 }
 0x110   :  { %v99_v39 = vsub.f32 1.5, %v98_v38 }
 0x111   :  { %v223_v40 = vpop.eup %222 }
 0x112   :  { %v100_v41 = vmul.f32 %v221_v34, %v99_v39  ;;  %v106_v42 = vmul.f32 %v223_v40, %v94_v35  ;;  %vm112_vm3 = vweird.f32 %v223_v40 }
 0x113   :  { %vm113_vm5 = vmor %vm111_vm4, %vm112_vm3 }
 0x114   :  { %v107_v44 = vmul.f32 %v223_v40, %v106_v42  ;;  %v104_v45 = vsel %vm103_vm2, %v221_v34, %v100_v41 }
 0x115   :  { %v115_v46 = vmul.f32 %v104_v45, %v382_v8 }
 0x116   :  { %v108_v48 = vmul.f32 0.5, %v107_v44 }
 0x117   :  { %v121_v49 = vmul.f32 %v217_v43, %v115_v46 }
 0x118   :  { %v109_v50 = vsub.f32 1.5, %v108_v48 }
 0x119   :  { %v127_v51 = vadd.f32 %v218_v47, %v121_v49 }
 0x11a   :  { %v110_v52 = vmul.f32 %v223_v40, %v109_v50 }
 0x11b   :  { %165 = vmatmul.f32.vlgmr.msra.gmra.mxu0 %v127_v51 }
 0x11c   :  { %v114_v53 = vsel %vm113_vm5, %v223_v40, %v110_v52 }
 0x11d   :  { %v116_v54 = vmul.f32 %v114_v53, %v386_v13 }
 0x11f   :  { %v122_v55 = vmul.f32 %v217_v43, %v116_v54 }
 0x121   :  { %v128_v56 = vadd.f32 %v218_v47, %v122_v55 }
 0x123   :  { %168 = vmatmul.f32.vlgmr.msra.gmra.mxu1 %v128_v56 }
 0x198   :  { %v166_v58 = vpop.f32.mrf.mxu0 }
 0x199   :  { %v167_v59 = vadd.f32 %v219_v57, %v166_v58 }
 0x19b   :  { %172 = vst [vmem:[#allocation8] sm:$0xff] %v167_v59 }
 0x1a0   :  { %v169_v60 = vpop.f32.mrf.mxu1 }
 0x1a1   :  { %v170_v61 = vadd.f32 %v219_v57, %v169_v60 }
 0x1a3   :  { %173 = vst [vmem:[#allocation8 + $0x8] sm:$0xff] %v170_v61 }
 0x1a4   :  { %186 = dma.vmem_to_hbm [thread:$0]  %s179_s16, 256, %s181_s19, [#allocation4], %s328_s7, %s328_s7, %s329_s8  }
 0x1a5   :  { %324 = dma.done.wait [#allocation4], 256  }
 0x1a6   :  { %325 = vsyncadd [#allocation4], 4294967040 }
 0x1a7   :  { %191 = vsyncpa [#allocation3], 1 }
 0x1a8   :  { %192 = vsyncpa [#allocation6], 1 }
 0x1a9   :  { %193 = vsyncpa [#allocation4], 1 }

</bundles_post_ra>
